<compile_context>
chip_gen: v7x
topology: tpu7x:2x2x1
jax: 0.10.0
libtpu: 0.0.40
codegen_flags: <defaults>
</compile_context>

<pallas_src>
import jax
import jax.numpy as jnp
from jax.experimental import pallas as pl
from jax.experimental.pallas import tpu as pltpu


def rnn_kernel(len_ref, x_ref, wih_ref, whh_ref, b_ref, wfc_ref, bfc_ref, out_ref):
    B = len_ref.shape[0]                      # batch
    SB = x_ref.shape[0]                       # seq_len * batch (flattened)
    S = SB // B
    H = whh_ref.shape[0]

    # (1) Hoisted input projection: one (S*B, E) @ (E, H) MXU matmul covers every
    #     timestep (bias b_ih + b_hh fused here, added once).
    xp = jnp.dot(x_ref[...], wih_ref[...],
                 preferred_element_type=jnp.float32) + b_ref[...]      # (S*B, H)

    lens = len_ref[...]                       # (B, 1) int32, loaded once
    w_hh = whh_ref[...]                       # (H, H), loaded once

    # (2) Fully unrolled time recurrence — a single basic block, no per-step grid/DMA
    #     overhead. Only h @ W_hh is serially dependent.
    #     pack_padded_sequence semantics: a sequence stops updating once t >= its length,
    #     so h ends up being each sequence's state at its last *valid* step.
    h = jnp.zeros((B, H), jnp.float32)        # h_0 = 0 (nn.RNN default)
    for t in range(S):                        # S is small & static: full unroll
        h_new = jnp.tanh(
            xp[t * B:(t + 1) * B, :]
            + jnp.dot(h, w_hh, preferred_element_type=jnp.float32)
        )
        h = jnp.where(lens > t, h_new, h)     # (B,1) mask broadcast over H (VPU only)

    # (3) dropout(p=0) is identity; fused final Linear.
    out_ref[...] = (
        jnp.dot(h, wfc_ref[...], preferred_element_type=jnp.float32) + bfc_ref[...]
    )


def packed_rnn_forward(text, text_lengths, params):
    """text: (S, B) int32; text_lengths: (B,) int32 (sorted descending, as
    pack_padded_sequence(enforce_sorted=True) requires)."""
    emb_table, w_ih, w_hh, b, w_fc, b_fc = params
    S, B = text.shape
    E = emb_table.shape[1]
    H = w_hh.shape[0]
    O = w_fc.shape[1]

    # Embedding lookup: plain-JAX gather glue, flattened to (S*B, E) so the kernel can
    # hoist the input projection into a single MXU matmul.
    embedded = emb_table[text].reshape(S * B, E)
    lengths = text_lengths.astype(jnp.int32).reshape(B, 1)
    b2 = b.reshape(1, H)
    bfc2 = b_fc.reshape(1, O)

    vmem_specs = [pl.BlockSpec(memory_space=pltpu.MemorySpace.VMEM) for _ in range(7)]
    return pl.pallas_call(
        rnn_kernel,
        out_shape=jax.ShapeDtypeStruct((B, O), jnp.float32),
        in_specs=vmem_specs,
        out_specs=pl.BlockSpec(memory_space=pltpu.MemorySpace.VMEM),
    )(lengths, embedded, w_ih, w_hh, b2, w_fc, bfc2)


def reference_forward(text, text_lengths, params):
    emb_table, w_ih, w_hh, b, w_fc, b_fc = params
    S, B = text.shape
    H = w_hh.shape[0]
    x = emb_table[text]
    h = jnp.zeros((B, H), jnp.float32)
    for t in range(S):
        h_new = jnp.tanh(x[t] @ w_ih + h @ w_hh + b)
        mask = (text_lengths > t)[:, None]
        h = jnp.where(mask, h_new, h)
    return h @ w_fc + b_fc


if __name__ == "__main__":
    # Module hyperparams (dropout=0).
    vocab_size, embedding_dim, hidden_dim, output_dim = 50, 32, 32, 4
    seq_len, batch = 8, 4

    key = jax.random.PRNGKey(0)
    ks = jax.random.split(key, 8)

    # Deterministic synthetic parameters (PyTorch shapes, stored transposed for x @ W).
    emb_table = jax.random.normal(ks[0], (vocab_size, embedding_dim), jnp.float32) * 0.1
    w_ih = jax.random.normal(ks[1], (embedding_dim, hidden_dim), jnp.float32) * 0.1   # W_ih^T
    w_hh = jax.random.normal(ks[2], (hidden_dim, hidden_dim), jnp.float32) * 0.1      # W_hh^T
    b_ih = jax.random.normal(ks[3], (hidden_dim,), jnp.float32) * 0.1
    b_hh = jax.random.normal(ks[4], (hidden_dim,), jnp.float32) * 0.1
    w_fc = jax.random.normal(ks[5], (hidden_dim, output_dim), jnp.float32) * 0.1      # fc.weight^T
    b_fc = jax.random.normal(ks[6], (output_dim,), jnp.float32) * 0.1
    params = (emb_table, w_ih, w_hh, b_ih + b_hh, w_fc, b_fc)

    # Inputs: (seq_len, batch) tokens; lengths sorted descending (enforce_sorted=True).
    text = jax.random.randint(ks[7], (seq_len, batch), 0, vocab_size, jnp.int32)
    text_lengths = jnp.array([8, 6, 5, 3], jnp.int32)

    out = packed_rnn_forward(text, text_lengths, params)
    out = jax.block_until_ready(out)

    ref = reference_forward(text, text_lengths, params)
    assert out.shape == (batch, output_dim)
    assert jnp.allclose(out, ref, atol=1e-5, rtol=1e-5), (out, ref)
    print("KERNEL_OK")
</pallas_src>

<mosaic_0001>
module attributes {stable_mosaic.version = 11 : i64} {
  func.func @rnn_kernel(%arg0: memref<4x1xi32, #tpu.memory_space<vmem>>, %arg1: memref<32x32xf32, #tpu.memory_space<vmem>>, %arg2: memref<32x32xf32, #tpu.memory_space<vmem>>, %arg3: memref<32x32xf32, #tpu.memory_space<vmem>>, %arg4: memref<1x32xf32, #tpu.memory_space<vmem>>, %arg5: memref<32x4xf32, #tpu.memory_space<vmem>>, %arg6: memref<1x4xf32, #tpu.memory_space<vmem>>, %arg7: memref<4x4xf32, #tpu.memory_space<vmem>>) attributes {dimension_semantics = [], scalar_prefetch = 0 : i64, scratch_operands = 0 : i64, tpu.core_type = #tpu.core_type<tc>} {
    %c0 = arith.constant 0 : index
    %c0_0 = arith.constant 0 : index
    %0 = vector.load %arg1[%c0, %c0_0] : memref<32x32xf32, #tpu.memory_space<vmem>>, vector<32x32xf32>
    %c0_1 = arith.constant 0 : index
    %c0_2 = arith.constant 0 : index
    %1 = vector.load %arg2[%c0_1, %c0_2] : memref<32x32xf32, #tpu.memory_space<vmem>>, vector<32x32xf32>
    %cst = arith.constant dense<0.000000e+00> : vector<32x32xf32>
    %2 = tpu.matmul %0, %1, %cst {dimension_numbers = #tpu.dot_dimension_numbers<[1], [0], [0], [1], [0, 0, 1, 1], [], []>} : vector<32x32xf32>, vector<32x32xf32>, vector<32x32xf32> -> vector<32x32xf32>
    %c0_3 = arith.constant 0 : index
    %c0_4 = arith.constant 0 : index
    %3 = vector.load %arg4[%c0_3, %c0_4] : memref<1x32xf32, #tpu.memory_space<vmem>>, vector<1x32xf32>
    %4 = vector.broadcast %3 : vector<1x32xf32> to vector<32x32xf32>
    %5 = arith.addf %2, %4 : vector<32x32xf32>
    %c0_5 = arith.constant 0 : index
    %c0_6 = arith.constant 0 : index
    %6 = vector.load %arg0[%c0_5, %c0_6] : memref<4x1xi32, #tpu.memory_space<vmem>>, vector<4x1xi32>
    %c0_7 = arith.constant 0 : index
    %c0_8 = arith.constant 0 : index
    %7 = vector.load %arg3[%c0_7, %c0_8] : memref<32x32xf32, #tpu.memory_space<vmem>>, vector<32x32xf32>
    %cst_9 = arith.constant 0.000000e+00 : f32
    %8 = vector.broadcast %cst_9 : f32 to vector<4x32xf32>
    %9 = vector.extract_strided_slice %5 {offsets = [0, 0], sizes = [4, 32], strides = [1, 1]} : vector<32x32xf32> to vector<4x32xf32>
    %cst_10 = arith.constant dense<0.000000e+00> : vector<4x32xf32>
    %10 = tpu.matmul %8, %7, %cst_10 {dimension_numbers = #tpu.dot_dimension_numbers<[1], [0], [0], [1], [0, 0, 1, 1], [], []>} : vector<4x32xf32>, vector<32x32xf32>, vector<4x32xf32> -> vector<4x32xf32>
    %11 = arith.addf %9, %10 : vector<4x32xf32>
    %12 = math.tanh %11 : vector<4x32xf32>
    %c0_i32 = arith.constant 0 : i32
    %13 = vector.broadcast %c0_i32 : i32 to vector<4x1xi32>
    %14 = arith.cmpi sgt, %6, %13 : vector<4x1xi32>
    %15 = vector.shape_cast %14 : vector<4x1xi1> to vector<4x1xi1>
    %16 = vector.broadcast %15 : vector<4x1xi1> to vector<4x32xi1>
    %17 = arith.select %16, %12, %8 : vector<4x32xi1>, vector<4x32xf32>
    %18 = vector.extract_strided_slice %5 {offsets = [4, 0], sizes = [4, 32], strides = [1, 1]} : vector<32x32xf32> to vector<4x32xf32>
    %cst_11 = arith.constant dense<0.000000e+00> : vector<4x32xf32>
    %19 = tpu.matmul %17, %7, %cst_11 {dimension_numbers = #tpu.dot_dimension_numbers<[1], [0], [0], [1], [0, 0, 1, 1], [], []>} : vector<4x32xf32>, vector<32x32xf32>, vector<4x32xf32> -> vector<4x32xf32>
    %20 = arith.addf %18, %19 : vector<4x32xf32>
    %21 = math.tanh %20 : vector<4x32xf32>
    %c1_i32 = arith.constant 1 : i32
    %22 = vector.broadcast %c1_i32 : i32 to vector<4x1xi32>
    %23 = arith.cmpi sgt, %6, %22 : vector<4x1xi32>
    %24 = vector.shape_cast %23 : vector<4x1xi1> to vector<4x1xi1>
    %25 = vector.broadcast %24 : vector<4x1xi1> to vector<4x32xi1>
    %26 = arith.select %25, %21, %17 : vector<4x32xi1>, vector<4x32xf32>
    %27 = vector.extract_strided_slice %5 {offsets = [8, 0], sizes = [4, 32], strides = [1, 1]} : vector<32x32xf32> to vector<4x32xf32>
    %cst_12 = arith.constant dense<0.000000e+00> : vector<4x32xf32>
    %28 = tpu.matmul %26, %7, %cst_12 {dimension_numbers = #tpu.dot_dimension_numbers<[1], [0], [0], [1], [0, 0, 1, 1], [], []>} : vector<4x32xf32>, vector<32x32xf32>, vector<4x32xf32> -> vector<4x32xf32>
    %29 = arith.addf %27, %28 : vector<4x32xf32>
    %30 = math.tanh %29 : vector<4x32xf32>
    %c2_i32 = arith.constant 2 : i32
    %31 = vector.broadcast %c2_i32 : i32 to vector<4x1xi32>
    %32 = arith.cmpi sgt, %6, %31 : vector<4x1xi32>
    %33 = vector.shape_cast %32 : vector<4x1xi1> to vector<4x1xi1>
    %34 = vector.broadcast %33 : vector<4x1xi1> to vector<4x32xi1>
    %35 = arith.select %34, %30, %26 : vector<4x32xi1>, vector<4x32xf32>
    %36 = vector.extract_strided_slice %5 {offsets = [12, 0], sizes = [4, 32], strides = [1, 1]} : vector<32x32xf32> to vector<4x32xf32>
    %cst_13 = arith.constant dense<0.000000e+00> : vector<4x32xf32>
    %37 = tpu.matmul %35, %7, %cst_13 {dimension_numbers = #tpu.dot_dimension_numbers<[1], [0], [0], [1], [0, 0, 1, 1], [], []>} : vector<4x32xf32>, vector<32x32xf32>, vector<4x32xf32> -> vector<4x32xf32>
    %38 = arith.addf %36, %37 : vector<4x32xf32>
    %39 = math.tanh %38 : vector<4x32xf32>
    %c3_i32 = arith.constant 3 : i32
    %40 = vector.broadcast %c3_i32 : i32 to vector<4x1xi32>
    %41 = arith.cmpi sgt, %6, %40 : vector<4x1xi32>
    %42 = vector.shape_cast %41 : vector<4x1xi1> to vector<4x1xi1>
    %43 = vector.broadcast %42 : vector<4x1xi1> to vector<4x32xi1>
    %44 = arith.select %43, %39, %35 : vector<4x32xi1>, vector<4x32xf32>
    %45 = vector.extract_strided_slice %5 {offsets = [16, 0], sizes = [4, 32], strides = [1, 1]} : vector<32x32xf32> to vector<4x32xf32>
    %cst_14 = arith.constant dense<0.000000e+00> : vector<4x32xf32>
    %46 = tpu.matmul %44, %7, %cst_14 {dimension_numbers = #tpu.dot_dimension_numbers<[1], [0], [0], [1], [0, 0, 1, 1], [], []>} : vector<4x32xf32>, vector<32x32xf32>, vector<4x32xf32> -> vector<4x32xf32>
    %47 = arith.addf %45, %46 : vector<4x32xf32>
    %48 = math.tanh %47 : vector<4x32xf32>
    %c4_i32 = arith.constant 4 : i32
    %49 = vector.broadcast %c4_i32 : i32 to vector<4x1xi32>
    %50 = arith.cmpi sgt, %6, %49 : vector<4x1xi32>
    %51 = vector.shape_cast %50 : vector<4x1xi1> to vector<4x1xi1>
    %52 = vector.broadcast %51 : vector<4x1xi1> to vector<4x32xi1>
    %53 = arith.select %52, %48, %44 : vector<4x32xi1>, vector<4x32xf32>
    %54 = vector.extract_strided_slice %5 {offsets = [20, 0], sizes = [4, 32], strides = [1, 1]} : vector<32x32xf32> to vector<4x32xf32>
    %cst_15 = arith.constant dense<0.000000e+00> : vector<4x32xf32>
    %55 = tpu.matmul %53, %7, %cst_15 {dimension_numbers = #tpu.dot_dimension_numbers<[1], [0], [0], [1], [0, 0, 1, 1], [], []>} : vector<4x32xf32>, vector<32x32xf32>, vector<4x32xf32> -> vector<4x32xf32>
    %56 = arith.addf %54, %55 : vector<4x32xf32>
    %57 = math.tanh %56 : vector<4x32xf32>
    %c5_i32 = arith.constant 5 : i32
    %58 = vector.broadcast %c5_i32 : i32 to vector<4x1xi32>
    %59 = arith.cmpi sgt, %6, %58 : vector<4x1xi32>
    %60 = vector.shape_cast %59 : vector<4x1xi1> to vector<4x1xi1>
    %61 = vector.broadcast %60 : vector<4x1xi1> to vector<4x32xi1>
    %62 = arith.select %61, %57, %53 : vector<4x32xi1>, vector<4x32xf32>
    %63 = vector.extract_strided_slice %5 {offsets = [24, 0], sizes = [4, 32], strides = [1, 1]} : vector<32x32xf32> to vector<4x32xf32>
    %cst_16 = arith.constant dense<0.000000e+00> : vector<4x32xf32>
    %64 = tpu.matmul %62, %7, %cst_16 {dimension_numbers = #tpu.dot_dimension_numbers<[1], [0], [0], [1], [0, 0, 1, 1], [], []>} : vector<4x32xf32>, vector<32x32xf32>, vector<4x32xf32> -> vector<4x32xf32>
    %65 = arith.addf %63, %64 : vector<4x32xf32>
    %66 = math.tanh %65 : vector<4x32xf32>
    %c6_i32 = arith.constant 6 : i32
    %67 = vector.broadcast %c6_i32 : i32 to vector<4x1xi32>
    %68 = arith.cmpi sgt, %6, %67 : vector<4x1xi32>
    %69 = vector.shape_cast %68 : vector<4x1xi1> to vector<4x1xi1>
    %70 = vector.broadcast %69 : vector<4x1xi1> to vector<4x32xi1>
    %71 = arith.select %70, %66, %62 : vector<4x32xi1>, vector<4x32xf32>
    %72 = vector.extract_strided_slice %5 {offsets = [28, 0], sizes = [4, 32], strides = [1, 1]} : vector<32x32xf32> to vector<4x32xf32>
    %cst_17 = arith.constant dense<0.000000e+00> : vector<4x32xf32>
    %73 = tpu.matmul %71, %7, %cst_17 {dimension_numbers = #tpu.dot_dimension_numbers<[1], [0], [0], [1], [0, 0, 1, 1], [], []>} : vector<4x32xf32>, vector<32x32xf32>, vector<4x32xf32> -> vector<4x32xf32>
    %74 = arith.addf %72, %73 : vector<4x32xf32>
    %75 = math.tanh %74 : vector<4x32xf32>
    %c7_i32 = arith.constant 7 : i32
    %76 = vector.broadcast %c7_i32 : i32 to vector<4x1xi32>
    %77 = arith.cmpi sgt, %6, %76 : vector<4x1xi32>
    %78 = vector.shape_cast %77 : vector<4x1xi1> to vector<4x1xi1>
    %79 = vector.broadcast %78 : vector<4x1xi1> to vector<4x32xi1>
    %80 = arith.select %79, %75, %71 : vector<4x32xi1>, vector<4x32xf32>
    %c0_18 = arith.constant 0 : index
    %c0_19 = arith.constant 0 : index
    %81 = vector.load %arg5[%c0_18, %c0_19] : memref<32x4xf32, #tpu.memory_space<vmem>>, vector<32x4xf32>
    %cst_20 = arith.constant dense<0.000000e+00> : vector<4x4xf32>
    %82 = tpu.matmul %80, %81, %cst_20 {dimension_numbers = #tpu.dot_dimension_numbers<[1], [0], [0], [1], [0, 0, 1, 1], [], []>} : vector<4x32xf32>, vector<32x4xf32>, vector<4x4xf32> -> vector<4x4xf32>
    %c0_21 = arith.constant 0 : index
    %c0_22 = arith.constant 0 : index
    %83 = vector.load %arg6[%c0_21, %c0_22] : memref<1x4xf32, #tpu.memory_space<vmem>>, vector<1x4xf32>
    %84 = vector.broadcast %83 : vector<1x4xf32> to vector<4x4xf32>
    %85 = arith.addf %82, %84 : vector<4x4xf32>
    %c0_23 = arith.constant 0 : index
    %c0_24 = arith.constant 0 : index
    %86 = vector.load %arg7[%c0_23, %c0_24] : memref<4x4xf32, #tpu.memory_space<vmem>>, vector<4x4xf32>
    tpu.vector_store %arg7[%c0_23, %c0_24], %85 {strides = array<i32>} : memref<4x4xf32, #tpu.memory_space<vmem>>, vector<4x4xf32>,
    return
  }
}

</mosaic_0001>

<bundles_post_ra>
// kernel: tpu_custom_call.1
= control target key start
LH: loop header
LB: loop body
LE: loop exit
PB: predicated region body
PF: predicated region fallthrough
CT: control target
= control target key end

     0   :  { %12 = vsyncpa [#allocation3], 0  ;;  %s1512_s0 = inlined_call_operand.vmem [shape: s32[4,1], index: 0, kind: input, shape index: {}]   ;;  %s1513_s1 = inlined_call_operand.vmem [shape: f32[32,32], index: 1, kind: input, shape index: {}]   ;;  %s1514_s2 = inlined_call_operand.hbm [shape: f32[32,32], index: 2, kind: input, shape index: {}]   ;;  %s1515_s3 = inlined_call_operand.hbm [shape: f32[32,32], index: 3, kind: input, shape index: {}]   ;;  %s1516_s4 = inlined_call_operand.vmem [shape: f32[1,32], index: 4, kind: input, shape index: {}]   ;;  %s1517_s5 = inlined_call_operand.vmem [shape: f32[32,4], index: 5, kind: input, shape index: {}]   ;;  %s1518_s6 = inlined_call_operand.vmem [shape: f32[1,4], index: 6, kind: input, shape index: {}]   ;;  %s1519_s7 = inlined_call_operand.hbm [shape: f32[4,4], index: 7, kind: output, shape index: {}]  }
   0x1   :  { %13 = vsyncpa [#allocation6], 0 }
   0x2   :  { %14 = vsyncpa [#allocation4], 0  ;;  %s1296_s24 = smov [#allocation2]   ;;  %s1224_s28 = scalar_lea.hbm %s1514_s2, 512 }
   0x3   :  { %s24_s25 = sshll.u32 %s1296_s24, 4  ;;  %p1225_p0 = scmp.ne.s32.totalorder %s1514_s2, %s1224_s28  ;;  %s25_s25 = int_to_ptr.vmem [resolvable:$true] %s24_s25 }
   0x4   :  { %p1228_p1 = scmp.lt.u32.totalorder %s1224_s28, %s1514_s2 }
   0x6   :  { %p1230_p2 = pnand %p1228_p1, %p1225_p0 }
   0x8   :  { %1233 = shalt.err (!%p1230_p2)
}
   0x9   :  { %s1234_s10 = scalar_lea.vmem %s25_s25, 512  ;;  %p1239_p4 = scmp.lt.s32.totalorder %s25_s25, %s25_s25 }
   0xa   :  { %p1235_p3 = scmp.ne.s32.totalorder %s25_s25, %s1234_s10  ;;  %p1240_p5 = scmp.lt.s32.totalorder %s1234_s10, %s1234_s10 }
   0xc   :  { %p1241_p6 = por %p1240_p5, %p1239_p4 }
   0xe   :  { %p1242_p7 = pnand %p1241_p6, %p1235_p3 }
  0x10   :  { %1245 = shalt.err (!%p1242_p7)
}
  0x11   :  { %s1297_s11 = smov 128   ;;  %s1298_s12 = smov 8  }
  0x12   :  { %30 = dma.hbm_to_vmem [thread:$0]  %s1514_s2, 512, %s25_s25, [#allocation3], %s1297_s11, %s1297_s11, %s1298_s12  }
  0x13   :  { %s1299_s15 = smov [#allocation5]   ;;  %s1246_s19 = scalar_lea.hbm %s1515_s3, 512 }
  0x14   :  { %s36_s16 = sshll.u32 %s1299_s15, 4  ;;  %p1247_p8 = scmp.ne.s32.totalorder %s1515_s3, %s1246_s19  ;;  %s37_s16 = int_to_ptr.vmem [resolvable:$true] %s36_s16 }
  0x15   :  { %p1250_p9 = scmp.lt.u32.totalorder %s1246_s19, %s1515_s3 }
  0x17   :  { %p1252_p10 = pnand %p1250_p9, %p1247_p8 }
  0x19   :  { %1255 = shalt.err (!%p1252_p10)
}
  0x1a   :  { %s1256_s24 = scalar_lea.vmem %s37_s16, 512  ;;  %p1261_p12 = scmp.lt.s32.totalorder %s37_s16, %s37_s16 }
  0x1b   :  { %p1257_p11 = scmp.ne.s32.totalorder %s37_s16, %s1256_s24  ;;  %p1262_p13 = scmp.lt.s32.totalorder %s1256_s24, %s1256_s24 }
  0x1d   :  { %p1263_p0 = por %p1262_p13, %p1261_p12 }
  0x1f   :  { %p1264_p1 = pnand %p1263_p0, %p1257_p11 }
  0x21   :  { %1267 = shalt.err (!%p1264_p1)
}
  0x22   :  { %42 = dma.hbm_to_vmem [thread:$0]  %s1515_s3, 512, %s37_s16, [#allocation6], %s1297_s11, %s1297_s11, %s1298_s12  }
  0x23   :  { %1290 = dma.done.wait [#allocation3], 512  }
  0x24   :  { %1291 = vsyncadd [#allocation3], 4294966784 }
  0x25   :  { %1292 = dma.done.wait [#allocation6], 512  }
  0x26   :  { %1293 = vsyncadd [#allocation6], 4294966784  ;;  %v1300_v0 = vmov 0.0|0.0   ;;  %vm1301_vm0 = vmmov 0   ;;  %v1302_v1 = vmov 0.0   ;;  %v1303_v2 = vmov 0  }
  0x27   :  { %1143 = vmatprep.subr.bf16.mxu1 %v1300_v0  ;;  %1044 = vmatprep.mubr.msk.f32.mxu1 %vm1301_vm0, %v1302_v1  ;;  %v59_v3 = vld [vmem:[#allocation2] sm:$0xff]  ;;  %v60_v4 = vld [vmem:[#allocation2 + $0x8] sm:$0xff]  ;;  %vm70_vm1 = vcmask 261120   ;;  %v61_v8 = vld [vmem:[#allocation2 + $0x10] sm:$0xff]  ;;  %s1304_s21 = smov [#allocation7]  }
  0x28   :  { %1206 = vset.pattern.permute.xlu0 %v1303_v2  ;;  %1207 = vset.pattern.permute.xlu1 %v1303_v2  ;;  %v169_v5 = vld [vmem:[#allocation5] sm:$0xff]  ;;  %v1135_v6 = vpack.c.bf16 %v60_v4, %v59_v3  ;;  %v170_v7 = vld [vmem:[#allocation5 + $0x8] sm:$0xff]  ;;  %v62_v9 = vld [vmem:[#allocation2 + $0x18] sm:$0xff] }
  0x29   :  { %v1374_v10 = vpack.c.bf16 %v170_v7, %v169_v5  ;;  %v1139_v11 = vpack.c.bf16 %v62_v9, %v61_v8  ;;  %v55_v12 = vld [vmem:[%s1513_s1] sm:$0xff]  ;;  %v172_v14 = vld [vmem:[#allocation5 + $0x18] sm:$0xff]  ;;  %v57_v22 = vld [vmem:[%s1513_s1 + $0x10] sm:$0xff] }
  0x2a   :  { %v171_v13 = vld [vmem:[#allocation5 + $0x10] sm:$0xff]  ;;  %1136 = vmatprep.subr.bf16.mxu0 %v1135_v6  ;;  %1030 = vmatprep.mubr.msk.f32.mxu0 %vm70_vm1, %v55_v12  ;;  %v56_v19 = vld [vmem:[%s1513_s1 + $0x8] sm:$0xff]  ;;  %v58_v23 = vld [vmem:[%s1513_s1 + $0x18] sm:$0xff] }
  0x2b   :  { %v1383_v15 = vld [vmem:[%s1512_s0] sm:$0xf]  ;;  %1138 = vmatpush3.bf16.msra.mxu0 %v1135_v6  ;;  %1145 = vmatpush3.bf16.msra.mxu1 %v1374_v10  ;;  %v1386_v16 = vpack.c.bf16 %v172_v14, %v171_v13 }
  0x2c   :  { %vm248_vm2 = vcmp.gt.s32.totalorder %v1383_v15, 0  ;;  %vm333_vm3 = vcmp.gt.s32.totalorder %v1383_v15, 1  ;;  %1140 = vmatprep.subr.bf16.mxu0 %v1139_v11  ;;  %1146 = vmatprep.subr.bf16.mxu1 %v1300_v0  ;;  %vm588_vm4 = vcmp.gt.s32.totalorder %v1383_v15, 4  ;;  %vm758_vm5 = vcmp.gt.s32.totalorder %v1383_v15, 6  ;;  %v1428_v24 = vld [vmem:[%s1516_s4] ss:$0 sm:$0xff] }
  0x2d   :  { %v249_v17 = vsel %vm248_vm2, 1, %v1303_v2  ;;  %v334_v18 = vsel %vm333_vm3, 1, %v1303_v2  ;;  %v589_v20 = vsel %vm588_vm4, 1, %v1303_v2  ;;  %v759_v21 = vsel %vm758_vm5, 1, %v1303_v2 }
  0x2e   :  { %251 = vperm.xlu0 %1206, %v249_v17   ;;  %vm418_vm7 = vcmp.gt.s32.totalorder %v1383_v15, 2  ;;  %vm503_vm8 = vcmp.gt.s32.totalorder %v1383_v15, 3  ;;  %vm673_vm9 = vcmp.gt.s32.totalorder %v1383_v15, 5  ;;  %vm843_vm10 = vcmp.gt.s32.totalorder %v1383_v15, 7 }
  0x2f   :  { %1142 = vmatpush3.bf16.msra.mxu0 %v1139_v11  ;;  %1148 = vmatpush3.bf16.msra.mxu1 %v1386_v16  ;;  %v419_v36 = vsel %vm418_vm7, 1, %v1303_v2  ;;  %v504_v37 = vsel %vm503_vm8, 1, %v1303_v2  ;;  %v674_v38 = vsel %vm673_vm9, 1, %v1303_v2  ;;  %v844_v39 = vsel %vm843_vm10, 1, %v1303_v2 }
  0x30   :  { %1149 = vmatprep.subr.bf16.mxu0 %v1300_v0  ;;  %1155 = vmatprep.subr.bf16.mxu1 %v1300_v0  ;;  %vm937_vm3 = vcmask 27648  }
  0x31   :  { %421 = vperm.xlu1 %1207, %v419_v36  }
  0x32   :  { %336 = vperm.xlu0 %1206, %v334_v18   ;;  %1031 = vmatmul.mubr.msk.f32.vlgmr.msra.gmra.mrb[0].mxu0 %vm70_vm1, %v56_v19 }
  0x33   :  { %1045 = vmatmul.mubr.f32.vlgmr.msra.gmra.mrb[0].mxu1 %v1302_v1  ;;  %1151 = vmatpush3.bf16.msra.mxu0 %v1374_v10 }
  0x34   :  { %1157 = vmatpush3.bf16.msra.mxu1 %v1374_v10  ;;  %1152 = vmatprep.subr.bf16.mxu0 %v1300_v0 }
  0x35   :  { %1158 = vmatprep.subr.bf16.mxu1 %v1300_v0  ;;  %1066 = vmatprep.mubr.msk.f32.mxu1 %vm1301_vm0, %v1302_v1 }
  0x36   :  { %591 = vperm.xlu0 %1206, %v589_v20   ;;  %1033 = vmatprep.mubr.msk.f32.mxu0 %vm70_vm1, %v57_v22 }
  0x37   :  { %1154 = vmatpush3.bf16.msra.mxu0 %v1386_v16  ;;  %506 = vperm.xlu1 %1207, %v504_v37  }
  0x38   :  { %1160 = vmatpush3.bf16.msra.mxu1 %v1386_v16  ;;  %1161 = vmatprep.subr.bf16.mxu0 %v1300_v0 }
  0x39   :  { %1167 = vmatprep.subr.bf16.mxu1 %v1300_v0  ;;  %1034 = vmatmul.mubr.msk.f32.gmra.mrb[2].mxu0 %vm70_vm1, %v58_v23  ;;  %v853_v23 = vld [vmem:[%s1517_s5] sm:$0xff] }
  0x3a   :  { %761 = vperm.xlu0 %1206, %v759_v21   ;;  %1055 = vmatprep.mubr.msk.f32.mxu0 %vm1301_vm0, %v1302_v1 }
  0x3b   :  { %676 = vperm.xlu1 %1207, %v674_v38  }
  0x3f   :  { %846 = vperm.xlu1 %1207, %v844_v39  }
  0xad   :  { %v252_v31 = vpop.permute.xlu0 %251 }
  0xae   :  { %vm253_vm6 = vcmp.eq.s32.totalorder %v252_v31, 1 }
  0xb0   :  { %v422_v52 = vpop.permute.xlu1 %421 }
  0xb1   :  { %v337_v45 = vpop.permute.xlu0 %336  ;;  %vm423_vm12 = vcmp.eq.s32.totalorder %v422_v52, 1 }
  0xb2   :  { %vm338_vm11 = vcmp.eq.s32.totalorder %v337_v45, 1 }
  0xb5   :  { %v592_v5 = vpop.permute.xlu0 %591 }
  0xb6   :  { %v507_v60 = vpop.permute.xlu1 %506  ;;  %vm593_vm14 = vcmp.eq.s32.totalorder %v592_v5, 1 }
  0xb7   :  { %vm508_vm13 = vcmp.eq.s32.totalorder %v507_v60, 1 }
  0xb9   :  { %v762_v20 = vpop.permute.xlu0 %761 }
  0xba   :  { %v677_v14 = vpop.permute.xlu1 %676  ;;  %vm763_vm2 = vcmp.eq.s32.totalorder %v762_v20, 1 }
  0xbb   :  { %vm678_vm15 = vcmp.eq.s32.totalorder %v677_v14, 1 }
 0x105   :  { %v1032_v25 = vpop.f32.mrb[0].mxu0 }
 0x106   :  { %v242_v26 = vpop.f32.mrb[0].mxu1  ;;  %v149_v27 = vpop.f32.mrb[1].mxu0  ;;  %v155_v48 = vadd.f32 %v1032_v25, %v1428_v24 }
 0x107   :  { %v1046_v28 = vpop.f32.mrb[1].mxu1  ;;  %v150_v29 = vadd.f32 %v1428_v24, %v149_v27 }
 0x109   :  { %v246_v30 = vadd.f32 %v242_v26, %v150_v29  ;;  %v856_v26 = vld [vmem:[%s1517_s5 + $0x18] sm:$0xff] }
 0x10b   :  { %1208 = vtanh.f32 %v246_v30 }
 0x10c   :  { %v1438_v34 = vpop.f32.mrb[2].mxu0 }
 0x10d   :  { %v159_v35 = vpop.f32.mrb[3].mxu0 }
 0x10e   :  { %v160_v63 = vadd.f32 %v1428_v24, %v159_v35  ;;  %v967_v35 = vld [vmem:[%s1518_s6] ss:$0 sm:$0xff] }
 0x115   :  { %v1209_v32 = vpop.eup %1208 }
 0x116   :  { %v254_v33 = vsel %vm253_vm6, %v1209_v32, 0.0  ;;  %v847_v32 = vpop.permute.xlu1 %846 }
 0x117   :  { %1056 = vmatmul.mubr.msk.f32.vlgmr.msra.gmra.mrb[4].mxu0 %vm70_vm1, %v254_v33 }
 0x118   :  { %1163 = vmatpush3.bf16.msra.mxu0 %v1374_v10  ;;  %1077 = vmatprep.mubr.msk.f32.mxu0 %vm1301_vm0, %v1302_v1 }
 0x119   :  { %1164 = vmatprep.subr.bf16.mxu0 %v1300_v0 }
 0x11c   :  { %1166 = vmatpush3.bf16.msra.mxu0 %v1386_v16 }
 0x11d   :  { %1173 = vmatprep.subr.bf16.mxu0 %v1300_v0 }
 0x1ea   :  { %v324_v40 = vpop.f32.mrb[4].mxu0 }
 0x1eb   :  { %v329_v41 = vrot.slane %v324_v40, 4  ;;  %v1057_v42 = vpop.f32.mrb[5].mxu0 }
 0x1ed   :  { %v331_v43 = vadd.f32 %v329_v41, %v150_v29 }
 0x1ef   :  { %1210 = vtanh.f32 %v331_v43 }
 0x1f9   :  { %v1211_v44 = vpop.eup %1210 }
 0x1fa   :  { %v340_v46 = vrot.slane %v1211_v44, 4 }
 0x1fc   :  { %v342_v47 = vsel %vm338_vm11, %v340_v46, %v254_v33 }
 0x1fd   :  { %1067 = vmatmul.mubr.msk.f32.vlgmr.msra.gmra.mrb[2].mxu1 %vm70_vm1, %v342_v47 }
 0x1fe   :  { %1169 = vmatpush3.bf16.msra.mxu1 %v1374_v10  ;;  %1088 = vmatprep.mubr.msk.f32.mxu1 %vm1301_vm0, %v1302_v1 }
 0x1ff   :  { %1170 = vmatprep.subr.bf16.mxu1 %v1300_v0 }
 0x202   :  { %1172 = vmatpush3.bf16.msra.mxu1 %v1386_v16 }
 0x203   :  { %1179 = vmatprep.subr.bf16.mxu1 %v1300_v0 }
 0x2d0   :  { %v412_v49 = vpop.f32.mrb[2].mxu1 }
 0x2d1   :  { %v416_v50 = vadd.f32 %v412_v49, %v155_v48  ;;  %v1068_v51 = vpop.f32.mrb[3].mxu1 }
 0x2d3   :  { %1212 = vtanh.f32 %v416_v50 }
 0x2dd   :  { %v1213_v53 = vpop.eup %1212 }
 0x2de   :  { %v424_v54 = vsel %vm423_vm12, %v1213_v53, %v342_v47 }
 0x2df   :  { %1078 = vmatmul.mubr.msk.f32.vlgmr.msra.gmra.mrb[6].mxu0 %vm70_vm1, %v424_v54 }
 0x2e0   :  { %1175 = vmatpush3.bf16.msra.mxu0 %v1374_v10  ;;  %1099 = vmatprep.mubr.msk.f32.mxu0 %vm1301_vm0, %v1302_v1 }
 0x2e1   :  { %1176 = vmatprep.subr.bf16.mxu0 %v1300_v0 }
 0x2e4   :  { %1178 = vmatpush3.bf16.msra.mxu0 %v1386_v16 }
 0x2e5   :  { %1185 = vmatprep.subr.bf16.mxu0 %v1300_v0 }
 0x3b2   :  { %v494_v55 = vpop.f32.mrb[6].mxu0 }
 0x3b3   :  { %v499_v56 = vrot.slane %v494_v55, 4  ;;  %v1079_v57 = vpop.f32.mrb[7].mxu0 }
 0x3b5   :  { %v501_v58 = vadd.f32 %v499_v56, %v155_v48 }
 0x3b7   :  { %1214 = vtanh.f32 %v501_v58 }
 0x3c1   :  { %v1215_v59 = vpop.eup %1214 }
 0x3c2   :  { %v510_v61 = vrot.slane %v1215_v59, 4 }
 0x3c4   :  { %v512_v62 = vsel %vm508_vm13, %v510_v61, %v424_v54 }
 0x3c5   :  { %1089 = vmatmul.mubr.msk.f32.vlgmr.msra.gmra.mrb[4].mxu1 %vm70_vm1, %v512_v62 }
 0x3c6   :  { %1181 = vmatpush3.bf16.msra.mxu1 %v1374_v10  ;;  %1110 = vmatprep.mubr.msk.f32.mxu1 %vm1301_vm0, %v1302_v1 }
 0x3c7   :  { %1182 = vmatprep.subr.bf16.mxu1 %v1300_v0 }
 0x3ca   :  { %1184 = vmatpush3.bf16.msra.mxu1 %v1386_v16 }
 0x3cb   :  { %1191 = vmatprep.subr.bf16.mxu1 %v1300_v0 }
 0x498   :  { %v582_v2 = vpop.f32.mrb[4].mxu1 }
 0x499   :  { %v586_v3 = vadd.f32 %v582_v2, %v160_v63  ;;  %v1090_v4 = vpop.f32.mrb[5].mxu1 }
 0x49b   :  { %1216 = vtanh.f32 %v586_v3 }
 0x4a5   :  { %v1217_v6 = vpop.eup %1216 }
 0x4a6   :  { %v594_v7 = vsel %vm593_vm14, %v1217_v6, %v512_v62 }
 0x4a7   :  { %1100 = vmatmul.mubr.msk.f32.vlgmr.msra.gmra.mrb[8].mxu0 %vm70_vm1, %v594_v7 }
 0x4a8   :  { %1187 = vmatpush3.bf16.msra.mxu0 %v1374_v10  ;;  %1121 = vmatprep.mubr.msk.f32.mxu0 %vm1301_vm0, %v1302_v1  ;;  %v165_v10 = vadd.f32 %v1438_v34, %v1428_v24  ;;  %v855_v24 = vld [vmem:[%s1517_s5 + $0x10] sm:$0xff] }
 0x4a9   :  { %1188 = vmatprep.subr.bf16.mxu0 %v1300_v0  ;;  %v1195_v27 = vpack.c.bf16 %v856_v26, %v855_v24 }
 0x4ac   :  { %1190 = vmatpush3.bf16.msra.mxu0 %v1386_v16 }
 0x57a   :  { %v664_v8 = vpop.f32.mrb[8].mxu0 }
 0x57b   :  { %v669_v9 = vrot.slane %v664_v8, 4  ;;  %v1101_v11 = vpop.f32.mrb[9].mxu0 }
 0x57d   :  { %v671_v12 = vadd.f32 %v669_v9, %v160_v63 }
 0x57f   :  { %1218 = vtanh.f32 %v671_v12 }
 0x589   :  { %v1219_v13 = vpop.eup %1218 }
 0x58a   :  { %v680_v15 = vrot.slane %v1219_v13, 4 }
 0x58c   :  { %v682_v17 = vsel %vm678_vm15, %v680_v15, %v594_v7 }
 0x58d   :  { %1111 = vmatmul.mubr.msk.f32.vlgmr.msra.gmra.mrb[6].mxu1 %vm70_vm1, %v682_v17 }
 0x58e   :  { %1132 = vmatprep.mubr.msk.f32.mxu1 %vm1301_vm0, %v1302_v1  ;;  %v854_v1 = vld [vmem:[%s1517_s5 + $0x8] sm:$0xff]  ;;  %vm848_vm0 = vcmp.eq.s32.totalorder %v847_v32, 1  ;;  %s945_s5 = sshll.u32 %s1304_s21, 4  ;;  %s946_s5 = int_to_ptr.vmem [resolvable:$true] %s945_s5 }
 0x58f   :  { %v1192_v25 = vpack.c.bf16 %v854_v1, %v853_v23  ;;  %s1268_s22 = scalar_lea.vmem %s946_s5, 64  ;;  %p1273_p3 = scmp.lt.s32.totalorder %s946_s5, %s946_s5 }
 0x590   :  { %p1269_p2 = scmp.ne.s32.totalorder %s946_s5, %s1268_s22  ;;  %p1274_p4 = scmp.lt.s32.totalorder %s1268_s22, %s1268_s22 }
 0x591   :  { %1193 = vmatpush3.bf16.msra.mxu1 %v1192_v25 }
 0x592   :  { %1194 = vmatprep.subr.bf16.mxu1 %v1300_v0  ;;  %p1275_p5 = por %p1274_p4, %p1273_p3 }
 0x594   :  { %p1276_p6 = pnand %p1275_p5, %p1269_p2 }
 0x595   :  { %1196 = vmatpush3.bf16.msra.mxu1 %v1195_v27 }
 0x660   :  { %v752_v18 = vpop.f32.mrb[6].mxu1 }
 0x661   :  { %v756_v16 = vadd.f32 %v752_v18, %v165_v10  ;;  %v1112_v19 = vpop.f32.mrb[7].mxu1 }
 0x663   :  { %1220 = vtanh.f32 %v756_v16 }
 0x66d   :  { %v1221_v21 = vpop.eup %1220 }
 0x66e   :  { %v764_v22 = vsel %vm763_vm2, %v1221_v21, %v682_v17 }
 0x66f   :  { %1122 = vmatmul.mubr.msk.f32.vlgmr.msra.gmra.mrb[10].mxu0 %vm70_vm1, %v764_v22 }
 0x742   :  { %v834_v28 = vpop.f32.mrb[10].mxu0 }
 0x743   :  { %v839_v29 = vrot.slane %v834_v28, 4  ;;  %v1123_v30 = vpop.f32.mrb[11].mxu0 }
 0x745   :  { %v841_v31 = vadd.f32 %v839_v29, %v165_v10 }
 0x747   :  { %1222 = vtanh.f32 %v841_v31 }
 0x751   :  { %v1223_v33 = vpop.eup %1222 }
 0x752   :  { %v850_v34 = vrot.slane %v1223_v33, 4 }
 0x754   :  { %v852_v0 = vsel %vm848_vm0, %v850_v34, %v764_v22 }
 0x755   :  { %1133 = vmatmul.mubr.msk.f32.vlgmr.msra.gmra.mrb[8].mxu1 %vm70_vm1, %v852_v0 }
 0x828   :  { %v933_v36 = vpop.f32.mrb[8].mxu1 }
 0x829   :  { %v934_v37 = vadd.f32 %v967_v35, %v933_v36  ;;  %v1134_v38 = vpop.f32.mrb[9].mxu1 }
 0x82b   :  { %938 = vst.msk [vmem:[#allocation7] sm:$0xf] %vm937_vm3, %v934_v37 }
 0x82c   :  { %1279 = shalt.err (!%p1276_p6)
}
 0x82d   :  { %s1280_s2 = scalar_lea.hbm %s1519_s7, 64 }
 0x82e   :  { %p1281_p7 = scmp.ne.s32.totalorder %s1519_s7, %s1280_s2  ;;  %p1284_p8 = scmp.lt.u32.totalorder %s1280_s2, %s1519_s7 }
 0x830   :  { %p1286_p9 = pnand %p1284_p8, %p1281_p7 }
 0x832   :  { %1289 = shalt.err (!%p1286_p9)
}
 0x833   :  { %948 = dma.vmem_to_hbm [thread:$0]  %s946_s5, 64, %s1519_s7, [#allocation4]  }
 0x834   :  { %1294 = dma.done.wait [#allocation4], 64  }
 0x835   :  { %1295 = vsyncadd [#allocation4], 4294967232 }
 0x836   :  { %952 = vsyncpa [#allocation3], 1 }
 0x837   :  { %953 = vsyncpa [#allocation6], 1 }
 0x838   :  { %954 = vsyncpa [#allocation4], 1 }

</bundles_post_ra>
